<compile_context>
chip_gen: v7x
topology: tpu7x:2x2x1
jax: 0.10.0
libtpu: 0.0.40
codegen_flags: <defaults>
</compile_context>

<pallas_src>
import math

import jax
import jax.numpy as jnp
from jax import lax
from jax.experimental import pallas as pl
from jax.experimental.pallas import tpu as pltpu


# --------------------------- in-kernel helpers --------------------------------

def _layernorm_fused(x, gamma, beta, eps=1e-5):
    # Single-pass LayerNorm (biased variance, eps=1e-5, affine), f32.
    # var = E[x^2] - mu^2  (one XLU reduction pass instead of two).
    mu = jnp.mean(x, axis=-1, keepdims=True)
    ms = jnp.mean(x * x, axis=-1, keepdims=True)
    var = ms - mu * mu
    return (x - mu) * lax.rsqrt(var + eps) * gamma + beta


def _gelu_exact(x):
    # PyTorch nn.GELU() default = exact erf formulation, f32.
    return 0.5 * x * (1.0 + lax.erf(x * (1.0 / math.sqrt(2.0))))


# ------------------------------- kernel ---------------------------------------

def mixer_kernel(x_ref,                       # (N, D)  activations, f32 (one batch)
                 g1_ref, be1_ref,             # norm1 gamma/beta        (1, D) f32
                 wp1_ref, bp1_ref,            # patch_mixer[0]: (Pm, N) bf16, (Pm, 1) f32
                 wp2_ref, bp2_ref,            # patch_mixer[2]: (N, Pm) bf16, (N, 1)  f32
                 g2_ref, be2_ref,             # norm2 gamma/beta        (1, D) f32
                 wc1_ref, bc1_ref,            # channel_mixer[0].T: (D, Cm) bf16, (1, Cm) f32
                 wc2_ref, bc2_ref,            # channel_mixer[2].T: (Cm, D) bf16, (1, D)  f32
                 o_ref):                      # (N, D)
    x = x_ref[...]                                           # (N, D) f32

    # ---- token (patch) mixing: x + patch_mixer(norm1(x).T).T ----
    # Transpose-free:  W2 @ gelu(W1 @ y + b1) + b2  lands directly in (N, D).
    y = _layernorm_fused(x, g1_ref[...], be1_ref[...])       # (N, D) f32
    y_bf = y.astype(jnp.bfloat16)
    h = jnp.dot(wp1_ref[...], y_bf,
                preferred_element_type=jnp.float32) + bp1_ref[...]      # (Pm, D) f32
    h = _gelu_exact(h).astype(jnp.bfloat16)
    p = jnp.dot(wp2_ref[...], h,
                preferred_element_type=jnp.float32) + bp2_ref[...]      # (N, D) f32
    x1 = x + p

    # ---- channel mixing: x1 + channel_mixer(norm2(x1)) ----
    z = _layernorm_fused(x1, g2_ref[...], be2_ref[...])      # (N, D) f32
    h2 = jnp.dot(z.astype(jnp.bfloat16), wc1_ref[...],
                 preferred_element_type=jnp.float32) + bc1_ref[...]     # (N, Cm) f32
    h2 = _gelu_exact(h2).astype(jnp.bfloat16)
    c = jnp.dot(h2, wc2_ref[...],
                preferred_element_type=jnp.float32) + bc2_ref[...]      # (N, D) f32

    o_ref[...] = (x1 + c).astype(o_ref.dtype)


# ------------------------------- wrapper ---------------------------------------

def mlp_mixer(x, params):
    """x: (B, N, D) float32.  params: flat tuple of 12 arrays (see kernel)."""
    B, N, D = x.shape

    # Activation blocks: one batch element per grid step, lane-dense (N, D).
    act_spec = pl.BlockSpec((None, N, D), lambda b: (b, 0, 0))

    # Weights/params: constant index_map -> fetched once, VMEM-resident.
    def resident_spec(p):
        nd = p.ndim
        return pl.BlockSpec(p.shape, lambda b, _nd=nd: (0,) * _nd)

    in_specs = [act_spec] + [resident_spec(p) for p in params]

    return pl.pallas_call(
        mixer_kernel,
        grid=(B,),
        in_specs=in_specs,
        out_specs=pl.BlockSpec((None, N, D), lambda b: (b, 0, 0)),
        out_shape=jax.ShapeDtypeStruct((B, N, D), x.dtype),
        compiler_params=pltpu.CompilerParams(
            dimension_semantics=("parallel",),
            vmem_limit_bytes=32 * 1024 * 1024,
        ),
    )(x, *params)


# -------------------------- param construction ---------------------------------

def init_params(key, num_patches, embed_dims, patch_expansion, channel_expansion):
    Pm = int(patch_expansion * num_patches)
    Cm = int(channel_expansion * embed_dims)
    ks = jax.random.split(key, 8)
    scale = 0.02

    # Patch-mixer weights kept in native PyTorch (out_features, in_features)
    # orientation (kernel computes W @ activation -> no transposes anywhere).
    # Matmul weights are stored bf16 (wrapper-side quantization; halves DMA).
    wp1 = (scale * jax.random.normal(ks[0], (Pm, num_patches), jnp.float32)).astype(jnp.bfloat16)
    bp1 = scale * jax.random.normal(ks[1], (Pm, 1), jnp.float32)
    wp2 = (scale * jax.random.normal(ks[2], (num_patches, Pm), jnp.float32)).astype(jnp.bfloat16)
    bp2 = scale * jax.random.normal(ks[3], (num_patches, 1), jnp.float32)

    # Channel-mixer weights stored pre-transposed as (in, out) so the kernel does x @ W.
    wc1 = (scale * jax.random.normal(ks[4], (embed_dims, Cm), jnp.float32)).astype(jnp.bfloat16)
    bc1 = scale * jax.random.normal(ks[5], (1, Cm), jnp.float32)
    wc2 = (scale * jax.random.normal(ks[6], (Cm, embed_dims), jnp.float32)).astype(jnp.bfloat16)
    bc2 = scale * jax.random.normal(ks[7], (1, embed_dims), jnp.float32)

    g1 = jnp.ones((1, embed_dims), jnp.float32)
    be1 = jnp.zeros((1, embed_dims), jnp.float32)
    g2 = jnp.ones((1, embed_dims), jnp.float32)
    be2 = jnp.zeros((1, embed_dims), jnp.float32)

    return (g1, be1, wp1, bp1, wp2, bp2, g2, be2, wc1, bc1, wc2, bc2)


# ---------------------------- pure-JAX reference --------------------------------
# Direct transcription of the PyTorch forward (f32 throughout; the bf16 weight
# copies are up-cast so kernel-vs-reference only differs by the bf16 matmul
# operand rounding and the fused-variance LayerNorm).

def ref_forward(x, params):
    (g1, be1, wp1, bp1, wp2, bp2, g2, be2, wc1, bc1, wc2, bc2) = params
    wp1 = wp1.astype(jnp.float32)
    wp2 = wp2.astype(jnp.float32)
    wc1 = wc1.astype(jnp.float32)
    wc2 = wc2.astype(jnp.float32)

    def ln(v, g, b):
        mu = jnp.mean(v, -1, keepdims=True)
        var = jnp.mean((v - mu) ** 2, -1, keepdims=True)
        return (v - mu) * lax.rsqrt(var + 1e-5) * g + b

    def gelu(v):
        return 0.5 * v * (1.0 + lax.erf(v / jnp.sqrt(2.0)))

    y = ln(x, g1, be1)                                       # (B, N, D)
    yt = jnp.swapaxes(y, 1, 2)                               # (B, D, N)
    h = gelu(yt @ wp1.T + bp1[:, 0])                         # (B, D, Pm)  (PyTorch Linear: x @ W.T + b)
    p = h @ wp2.T + bp2[:, 0]                                # (B, D, N)
    x1 = x + jnp.swapaxes(p, 1, 2)                           # (B, N, D)
    z = ln(x1, g2, be2)
    c = gelu(z @ wc1 + bc1) @ wc2 + bc2                      # wc1/wc2 already stored as W.T
    return x1 + c


# ----------------------------------- main ---------------------------------------

if __name__ == "__main__":
    B = 2
    num_patches = 8
    embed_dims = 128          # lane-dense (D == 128) activation blocks
    patch_expansion = 2.0     # -> patch_mix_dims   = 16
    channel_expansion = 2.0   # -> channel_mix_dims = 256

    key = jax.random.PRNGKey(0)
    kx, kp = jax.random.split(key)
    x = jax.random.normal(kx, (B, num_patches, embed_dims), jnp.float32)
    params = init_params(kp, num_patches, embed_dims,
                         patch_expansion, channel_expansion)

    out = jax.block_until_ready(mlp_mixer(x, params))
    ref = jax.block_until_ready(ref_forward(x, params))

    assert out.shape == (B, num_patches, embed_dims)
    # bf16 matmul operands (f32 accumulation) + fused-variance LayerNorm
    # -> loosened tolerance vs the f32 reference.
    assert jnp.allclose(out, ref, atol=1e-2, rtol=1e-2), "mismatch vs reference"

    print("KERNEL_OK")
</pallas_src>

<mosaic_0001>
module attributes {stable_mosaic.version = 11 : i64} {
  func.func @mixer_kernel(%arg0: i32, %arg1: memref<1x8x128xf32, #tpu.memory_space<vmem>>, %arg2: memref<1x128xf32, #tpu.memory_space<vmem>>, %arg3: memref<1x128xf32, #tpu.memory_space<vmem>>, %arg4: memref<16x8xbf16, #tpu.memory_space<vmem>>, %arg5: memref<16x1xf32, #tpu.memory_space<vmem>>, %arg6: memref<8x16xbf16, #tpu.memory_space<vmem>>, %arg7: memref<8x1xf32, #tpu.memory_space<vmem>>, %arg8: memref<1x128xf32, #tpu.memory_space<vmem>>, %arg9: memref<1x128xf32, #tpu.memory_space<vmem>>, %arg10: memref<128x256xbf16, #tpu.memory_space<vmem>>, %arg11: memref<1x256xf32, #tpu.memory_space<vmem>>, %arg12: memref<256x128xbf16, #tpu.memory_space<vmem>>, %arg13: memref<1x128xf32, #tpu.memory_space<vmem>>, %arg14: memref<1x8x128xf32, #tpu.memory_space<vmem>>) attributes {dimension_semantics = [#tpu.dimension_semantics<parallel>], iteration_bounds = array<i64: 2>, scalar_prefetch = 0 : i64, scratch_operands = 0 : i64, tpu.core_type = #tpu.core_type<tc>, window_params = [{transform_indices = @transform_0, window_bounds = array<i64: 1, 8, 128>}, {pipeline_mode = #tpu.pipeline_mode<synchronous>, transform_indices = @transform_1, window_bounds = array<i64: 1, 128>}, {pipeline_mode = #tpu.pipeline_mode<synchronous>, transform_indices = @transform_2, window_bounds = array<i64: 1, 128>}, {pipeline_mode = #tpu.pipeline_mode<synchronous>, transform_indices = @transform_3, window_bounds = array<i64: 16, 8>}, {pipeline_mode = #tpu.pipeline_mode<synchronous>, transform_indices = @transform_4, window_bounds = array<i64: 16, 1>}, {pipeline_mode = #tpu.pipeline_mode<synchronous>, transform_indices = @transform_5, window_bounds = array<i64: 8, 16>}, {pipeline_mode = #tpu.pipeline_mode<synchronous>, transform_indices = @transform_6, window_bounds = array<i64: 8, 1>}, {pipeline_mode = #tpu.pipeline_mode<synchronous>, transform_indices = @transform_7, window_bounds = array<i64: 1, 128>}, {pipeline_mode = #tpu.pipeline_mode<synchronous>, transform_indices = @transform_8, window_bounds = array<i64: 1, 128>}, {pipeline_mode = #tpu.pipeline_mode<synchronous>, transform_indices = @transform_9, window_bounds = array<i64: 128, 256>}, {pipeline_mode = #tpu.pipeline_mode<synchronous>, transform_indices = @transform_10, window_bounds = array<i64: 1, 256>}, {pipeline_mode = #tpu.pipeline_mode<synchronous>, transform_indices = @transform_11, window_bounds = array<i64: 256, 128>}, {pipeline_mode = #tpu.pipeline_mode<synchronous>, transform_indices = @transform_12, window_bounds = array<i64: 1, 128>}, {transform_indices = @transform_13, window_bounds = array<i64: 1, 8, 128>}]} {
    %c0 = arith.constant 0 : index
    %c0_0 = arith.constant 0 : index
    %c0_1 = arith.constant 0 : index
    %0 = vector.load %arg1[%c0, %c0_0, %c0_1] : memref<1x8x128xf32, #tpu.memory_space<vmem>>, vector<1x8x128xf32>
    %1 = vector.shape_cast %0 : vector<1x8x128xf32> to vector<8x128xf32>
    %c0_2 = arith.constant 0 : index
    %c0_3 = arith.constant 0 : index
    %2 = vector.load %arg2[%c0_2, %c0_3] : memref<1x128xf32, #tpu.memory_space<vmem>>, vector<1x128xf32>
    %c0_4 = arith.constant 0 : index
    %c0_5 = arith.constant 0 : index
    %3 = vector.load %arg3[%c0_4, %c0_5] : memref<1x128xf32, #tpu.memory_space<vmem>>, vector<1x128xf32>
    %cst = arith.constant dense<0.000000e+00> : vector<8xf32>
    %4 = vector.multi_reduction <add>, %1, %cst [1] : vector<8x128xf32> to vector<8xf32>
    %5 = vector.shape_cast %4 : vector<8xf32> to vector<8x1xf32>
    %cst_6 = arith.constant 1.280000e+02 : f32
    %6 = vector.broadcast %cst_6 : f32 to vector<8x1xf32>
    %7 = arith.divf %5, %6 : vector<8x1xf32>
    %8 = arith.mulf %1, %1 : vector<8x128xf32>
    %cst_7 = arith.constant dense<0.000000e+00> : vector<8xf32>
    %9 = vector.multi_reduction <add>, %8, %cst_7 [1] : vector<8x128xf32> to vector<8xf32>
    %10 = vector.shape_cast %9 : vector<8xf32> to vector<8x1xf32>
    %cst_8 = arith.constant 1.280000e+02 : f32
    %11 = vector.broadcast %cst_8 : f32 to vector<8x1xf32>
    %12 = arith.divf %10, %11 : vector<8x1xf32>
    %13 = arith.mulf %7, %7 : vector<8x1xf32>
    %14 = arith.subf %12, %13 : vector<8x1xf32>
    %15 = vector.broadcast %7 : vector<8x1xf32> to vector<8x128xf32>
    %16 = arith.subf %1, %15 : vector<8x128xf32>
    %cst_9 = arith.constant 9.99999974E-6 : f32
    %17 = vector.broadcast %cst_9 : f32 to vector<8x1xf32>
    %18 = arith.addf %14, %17 : vector<8x1xf32>
    %19 = math.rsqrt %18 : vector<8x1xf32>
    %20 = vector.broadcast %19 : vector<8x1xf32> to vector<8x128xf32>
    %21 = arith.mulf %16, %20 : vector<8x128xf32>
    %22 = vector.broadcast %2 : vector<1x128xf32> to vector<8x128xf32>
    %23 = arith.mulf %21, %22 : vector<8x128xf32>
    %24 = vector.broadcast %3 : vector<1x128xf32> to vector<8x128xf32>
    %25 = arith.addf %23, %24 : vector<8x128xf32>
    %26 = arith.truncf %25 : vector<8x128xf32> to vector<8x128xbf16>
    %c0_10 = arith.constant 0 : index
    %c0_11 = arith.constant 0 : index
    %27 = vector.load %arg4[%c0_10, %c0_11] : memref<16x8xbf16, #tpu.memory_space<vmem>>, vector<16x8xbf16>
    %cst_12 = arith.constant dense<0.000000e+00> : vector<16x128xf32>
    %28 = tpu.matmul %27, %26, %cst_12 {dimension_numbers = #tpu.dot_dimension_numbers<[1], [0], [0], [1], [0, 0, 1, 1], [], []>} : vector<16x8xbf16>, vector<8x128xbf16>, vector<16x128xf32> -> vector<16x128xf32>
    %c0_13 = arith.constant 0 : index
    %c0_14 = arith.constant 0 : index
    %29 = vector.load %arg5[%c0_13, %c0_14] : memref<16x1xf32, #tpu.memory_space<vmem>>, vector<16x1xf32>
    %30 = vector.broadcast %29 : vector<16x1xf32> to vector<16x128xf32>
    %31 = arith.addf %28, %30 : vector<16x128xf32>
    %cst_15 = arith.constant 5.000000e-01 : f32
    %32 = vector.broadcast %cst_15 : f32 to vector<16x128xf32>
    %33 = arith.mulf %32, %31 : vector<16x128xf32>
    %cst_16 = arith.constant 0.707106769 : f32
    %34 = vector.broadcast %cst_16 : f32 to vector<16x128xf32>
    %35 = arith.mulf %31, %34 : vector<16x128xf32>
    %36 = math.erf %35 : vector<16x128xf32>
    %cst_17 = arith.constant 1.000000e+00 : f32
    %37 = vector.broadcast %cst_17 : f32 to vector<16x128xf32>
    %38 = arith.addf %37, %36 : vector<16x128xf32>
    %39 = arith.mulf %33, %38 : vector<16x128xf32>
    %40 = arith.truncf %39 : vector<16x128xf32> to vector<16x128xbf16>
    %c0_18 = arith.constant 0 : index
    %c0_19 = arith.constant 0 : index
    %41 = vector.load %arg6[%c0_18, %c0_19] : memref<8x16xbf16, #tpu.memory_space<vmem>>, vector<8x16xbf16>
    %cst_20 = arith.constant dense<0.000000e+00> : vector<8x128xf32>
    %42 = tpu.matmul %41, %40, %cst_20 {dimension_numbers = #tpu.dot_dimension_numbers<[1], [0], [0], [1], [0, 0, 1, 1], [], []>} : vector<8x16xbf16>, vector<16x128xbf16>, vector<8x128xf32> -> vector<8x128xf32>
    %c0_21 = arith.constant 0 : index
    %c0_22 = arith.constant 0 : index
    %43 = vector.load %arg7[%c0_21, %c0_22] : memref<8x1xf32, #tpu.memory_space<vmem>>, vector<8x1xf32>
    %44 = vector.broadcast %43 : vector<8x1xf32> to vector<8x128xf32>
    %45 = arith.addf %42, %44 : vector<8x128xf32>
    %46 = arith.addf %1, %45 : vector<8x128xf32>
    %c0_23 = arith.constant 0 : index
    %c0_24 = arith.constant 0 : index
    %47 = vector.load %arg8[%c0_23, %c0_24] : memref<1x128xf32, #tpu.memory_space<vmem>>, vector<1x128xf32>
    %c0_25 = arith.constant 0 : index
    %c0_26 = arith.constant 0 : index
    %48 = vector.load %arg9[%c0_25, %c0_26] : memref<1x128xf32, #tpu.memory_space<vmem>>, vector<1x128xf32>
    %cst_27 = arith.constant dense<0.000000e+00> : vector<8xf32>
    %49 = vector.multi_reduction <add>, %46, %cst_27 [1] : vector<8x128xf32> to vector<8xf32>
    %50 = vector.shape_cast %49 : vector<8xf32> to vector<8x1xf32>
    %cst_28 = arith.constant 1.280000e+02 : f32
    %51 = vector.broadcast %cst_28 : f32 to vector<8x1xf32>
    %52 = arith.divf %50, %51 : vector<8x1xf32>
    %53 = arith.mulf %46, %46 : vector<8x128xf32>
    %cst_29 = arith.constant dense<0.000000e+00> : vector<8xf32>
    %54 = vector.multi_reduction <add>, %53, %cst_29 [1] : vector<8x128xf32> to vector<8xf32>
    %55 = vector.shape_cast %54 : vector<8xf32> to vector<8x1xf32>
    %cst_30 = arith.constant 1.280000e+02 : f32
    %56 = vector.broadcast %cst_30 : f32 to vector<8x1xf32>
    %57 = arith.divf %55, %56 : vector<8x1xf32>
    %58 = arith.mulf %52, %52 : vector<8x1xf32>
    %59 = arith.subf %57, %58 : vector<8x1xf32>
    %60 = vector.broadcast %52 : vector<8x1xf32> to vector<8x128xf32>
    %61 = arith.subf %46, %60 : vector<8x128xf32>
    %cst_31 = arith.constant 9.99999974E-6 : f32
    %62 = vector.broadcast %cst_31 : f32 to vector<8x1xf32>
    %63 = arith.addf %59, %62 : vector<8x1xf32>
    %64 = math.rsqrt %63 : vector<8x1xf32>
    %65 = vector.broadcast %64 : vector<8x1xf32> to vector<8x128xf32>
    %66 = arith.mulf %61, %65 : vector<8x128xf32>
    %67 = vector.broadcast %47 : vector<1x128xf32> to vector<8x128xf32>
    %68 = arith.mulf %66, %67 : vector<8x128xf32>
    %69 = vector.broadcast %48 : vector<1x128xf32> to vector<8x128xf32>
    %70 = arith.addf %68, %69 : vector<8x128xf32>
    %71 = arith.truncf %70 : vector<8x128xf32> to vector<8x128xbf16>
    %c0_32 = arith.constant 0 : index
    %c0_33 = arith.constant 0 : index
    %72 = vector.load %arg10[%c0_32, %c0_33] : memref<128x256xbf16, #tpu.memory_space<vmem>>, vector<128x256xbf16>
    %cst_34 = arith.constant dense<0.000000e+00> : vector<8x256xf32>
    %73 = tpu.matmul %71, %72, %cst_34 {dimension_numbers = #tpu.dot_dimension_numbers<[1], [0], [0], [1], [0, 0, 1, 1], [], []>} : vector<8x128xbf16>, vector<128x256xbf16>, vector<8x256xf32> -> vector<8x256xf32>
    %c0_35 = arith.constant 0 : index
    %c0_36 = arith.constant 0 : index
    %74 = vector.load %arg11[%c0_35, %c0_36] : memref<1x256xf32, #tpu.memory_space<vmem>>, vector<1x256xf32>
    %75 = vector.broadcast %74 : vector<1x256xf32> to vector<8x256xf32>
    %76 = arith.addf %73, %75 : vector<8x256xf32>
    %cst_37 = arith.constant 5.000000e-01 : f32
    %77 = vector.broadcast %cst_37 : f32 to vector<8x256xf32>
    %78 = arith.mulf %77, %76 : vector<8x256xf32>
    %cst_38 = arith.constant 0.707106769 : f32
    %79 = vector.broadcast %cst_38 : f32 to vector<8x256xf32>
    %80 = arith.mulf %76, %79 : vector<8x256xf32>
    %81 = math.erf %80 : vector<8x256xf32>
    %cst_39 = arith.constant 1.000000e+00 : f32
    %82 = vector.broadcast %cst_39 : f32 to vector<8x256xf32>
    %83 = arith.addf %82, %81 : vector<8x256xf32>
    %84 = arith.mulf %78, %83 : vector<8x256xf32>
    %85 = arith.truncf %84 : vector<8x256xf32> to vector<8x256xbf16>
    %c0_40 = arith.constant 0 : index
    %c0_41 = arith.constant 0 : index
    %86 = vector.load %arg12[%c0_40, %c0_41] : memref<256x128xbf16, #tpu.memory_space<vmem>>, vector<256x128xbf16>
    %cst_42 = arith.constant dense<0.000000e+00> : vector<8x128xf32>
    %87 = tpu.matmul %85, %86, %cst_42 {dimension_numbers = #tpu.dot_dimension_numbers<[1], [0], [0], [1], [0, 0, 1, 1], [], []>} : vector<8x256xbf16>, vector<256x128xbf16>, vector<8x128xf32> -> vector<8x128xf32>
    %c0_43 = arith.constant 0 : index
    %c0_44 = arith.constant 0 : index
    %88 = vector.load %arg13[%c0_43, %c0_44] : memref<1x128xf32, #tpu.memory_space<vmem>>, vector<1x128xf32>
    %89 = vector.broadcast %88 : vector<1x128xf32> to vector<8x128xf32>
    %90 = arith.addf %87, %89 : vector<8x128xf32>
    %91 = arith.addf %46, %90 : vector<8x128xf32>
    %c0_45 = arith.constant 0 : index
    %c0_46 = arith.constant 0 : index
    %c0_47 = arith.constant 0 : index
    %92 = vector.load %arg14[%c0_45, %c0_46, %c0_47] : memref<1x8x128xf32, #tpu.memory_space<vmem>>, vector<1x8x128xf32>
    %93 = vector.shape_cast %92 : vector<1x8x128xf32> to vector<8x128xf32>
    %94 = vector.shape_cast %91 : vector<8x128xf32> to vector<1x8x128xf32>
    tpu.vector_store %arg14[%c0_45, %c0_46, %c0_47], %94 {strides = array<i32>} : memref<1x8x128xf32, #tpu.memory_space<vmem>>, vector<1x8x128xf32>,
    return
  }
  func.func @transform_0(%arg0: i32) -> (i32, i32, i32) {
    %c0_i32 = arith.constant 0 : i32
    %c0_i32_0 = arith.constant 0 : i32
    %c0_i32_1 = arith.constant 0 : i32
    return %arg0, %c0_i32, %c0_i32_0 : i32, i32, i32
  }
  func.func @transform_1(%arg0: i32) -> (i32, i32) {
    %c0_i32 = arith.constant 0 : i32
    %c0_i32_0 = arith.constant 0 : i32
    %c0_i32_1 = arith.constant 0 : i32
    return %c0_i32, %c0_i32_0 : i32, i32
  }
  func.func @transform_2(%arg0: i32) -> (i32, i32) {
    %c0_i32 = arith.constant 0 : i32
    %c0_i32_0 = arith.constant 0 : i32
    %c0_i32_1 = arith.constant 0 : i32
    return %c0_i32, %c0_i32_0 : i32, i32
  }
  func.func @transform_3(%arg0: i32) -> (i32, i32) {
    %c0_i32 = arith.constant 0 : i32
    %c0_i32_0 = arith.constant 0 : i32
    %c0_i32_1 = arith.constant 0 : i32
    return %c0_i32, %c0_i32_0 : i32, i32
  }
  func.func @transform_4(%arg0: i32) -> (i32, i32) {
    %c0_i32 = arith.constant 0 : i32
    %c0_i32_0 = arith.constant 0 : i32
    %c0_i32_1 = arith.constant 0 : i32
    return %c0_i32, %c0_i32_0 : i32, i32
  }
  func.func @transform_5(%arg0: i32) -> (i32, i32) {
    %c0_i32 = arith.constant 0 : i32
    %c0_i32_0 = arith.constant 0 : i32
    %c0_i32_1 = arith.constant 0 : i32
    return %c0_i32, %c0_i32_0 : i32, i32
  }
  func.func @transform_6(%arg0: i32) -> (i32, i32) {
    %c0_i32 = arith.constant 0 : i32
    %c0_i32_0 = arith.constant 0 : i32
    %c0_i32_1 = arith.constant 0 : i32
    return %c0_i32, %c0_i32_0 : i32, i32
  }
  func.func @transform_7(%arg0: i32) -> (i32, i32) {
    %c0_i32 = arith.constant 0 : i32
    %c0_i32_0 = arith.constant 0 : i32
    %c0_i32_1 = arith.constant 0 : i32
    return %c0_i32, %c0_i32_0 : i32, i32
  }
  func.func @transform_8(%arg0: i32) -> (i32, i32) {
    %c0_i32 = arith.constant 0 : i32
    %c0_i32_0 = arith.constant 0 : i32
    %c0_i32_1 = arith.constant 0 : i32
    return %c0_i32, %c0_i32_0 : i32, i32
  }
  func.func @transform_9(%arg0: i32) -> (i32, i32) {
    %c0_i32 = arith.constant 0 : i32
    %c0_i32_0 = arith.constant 0 : i32
    %c0_i32_1 = arith.constant 0 : i32
    return %c0_i32, %c0_i32_0 : i32, i32
  }
  func.func @transform_10(%arg0: i32) -> (i32, i32) {
    %c0_i32 = arith.constant 0 : i32
    %c0_i32_0 = arith.constant 0 : i32
    %c0_i32_1 = arith.constant 0 : i32
    return %c0_i32, %c0_i32_0 : i32, i32
  }
  func.func @transform_11(%arg0: i32) -> (i32, i32) {
    %c0_i32 = arith.constant 0 : i32
    %c0_i32_0 = arith.constant 0 : i32
    %c0_i32_1 = arith.constant 0 : i32
    return %c0_i32, %c0_i32_0 : i32, i32
  }
  func.func @transform_12(%arg0: i32) -> (i32, i32) {
    %c0_i32 = arith.constant 0 : i32
    %c0_i32_0 = arith.constant 0 : i32
    %c0_i32_1 = arith.constant 0 : i32
    return %c0_i32, %c0_i32_0 : i32, i32
  }
  func.func @transform_13(%arg0: i32) -> (i32, i32, i32) {
    %c0_i32 = arith.constant 0 : i32
    %c0_i32_0 = arith.constant 0 : i32
    %c0_i32_1 = arith.constant 0 : i32
    return %arg0, %c0_i32, %c0_i32_0 : i32, i32, i32
  }
}

</mosaic_0001>

<bundles_post_ra>
// kernel: tpu_custom_call.1
= control target key start
LH: loop header
LB: loop body
LE: loop exit
PB: predicated region body
PF: predicated region fallthrough
CT: control target
= control target key end

     0   :  { %s1734_s0 = inlined_call_operand.vmem [shape: f32[2,8,128], index: 0, kind: input, shape index: {}]   ;;  %s1735_s1 = inlined_call_operand.vmem [shape: f32[1,128], index: 1, kind: input, shape index: {}]   ;;  %s1736_s2 = inlined_call_operand.vmem [shape: f32[1,128], index: 2, kind: input, shape index: {}]   ;;  %s1737_s3 = inlined_call_operand.vmem [shape: bf16[16,8], index: 3, kind: input, shape index: {}]   ;;  %s1738_s4 = inlined_call_operand.vmem [shape: f32[16,1], index: 4, kind: input, shape index: {}]   ;;  %s1739_s5 = inlined_call_operand.vmem [shape: bf16[8,16], index: 5, kind: input, shape index: {}]   ;;  %s1740_s6 = inlined_call_operand.vmem [shape: f32[8,1], index: 6, kind: input, shape index: {}]   ;;  %s1741_s7 = inlined_call_operand.vmem [shape: f32[1,128], index: 7, kind: input, shape index: {}]   ;;  %s1742_s8 = inlined_call_operand.vmem [shape: f32[1,128], index: 8, kind: input, shape index: {}]   ;;  %s1743_s9 = inlined_call_operand.hbm [shape: bf16[128,256], index: 9, kind: input, shape index: {}]   ;;  %s1744_s10 = inlined_call_operand.vmem [shape: f32[1,256], index: 10, kind: input, shape index: {}]   ;;  %s1745_s11 = inlined_call_operand.hbm [shape: bf16[256,128], index: 11, kind: input, shape index: {}]   ;;  %s1746_s12 = inlined_call_operand.vmem [shape: f32[1,128], index: 12, kind: input, shape index: {}]   ;;  %s1747_s13 = inlined_call_operand.hbm [shape: f32[2,8,128], index: 13, kind: output, shape index: {}]  }
   0x1   :  { %1758 = sst [smem:[#allocation17_spill]] %s1747_s13 }
   0x2   :  { %18 = vsyncpa [#allocation3], 0 }
   0x3   :  { %19 = vsyncpa [#allocation6], 0 }
   0x4   :  { %20 = vsyncpa [#allocation4], 0 }
   0x5   :  { %22 = vsyncpa [#allocation4 + $0x1], 0  ;;  %s1515_s25 = smov 0   ;;  %s1517_s26 = smov 0  }
   0x6   :  { %s1519_s27 = smov 0   ;;  %s1521_s28 = smov 0  }
   0x7 LB: > { %1759 = sst [smem:[#allocation11_spill]] %s1421_s25  ;;  %s1536_s29 = sadd.s32 4294967295, %s1433_s28   ;;  %s1433_s28 = sphi %s1521_s28, %s1780_s28   ;;  %s1429_s27 = sphi %s1519_s27, %s1782_s27   ;;  %s1425_s26 = sphi %s1517_s26, %s1784_s26   ;;  %s1421_s25 = sphi %s1515_s25, %s1783_s25  }
   0x8   : > { %1760 = sst [smem:[#allocation12_spill]] %s1429_s27  ;;  %s1093_s30 = sadd.s32 4294967294, %s1433_s28  }
   0x9   : > { %1761 = sst [smem:[#allocation13_spill]] %s1433_s28  ;;  %s1540_s14 = sadd.s32 1, %s1433_s28  }
   0xa   : > { %1762 = sst [smem:[#allocation14_spill]] %s1540_s14  ;;  %s313_s15 = sadd.s32 1, %s1429_s27 }
   0xb   : > { %s310_s16 = ssub.s32 %s1433_s28, %s1540_s14  ;;  %p323_p0 = scmp.ne.s32.totalorder %s1429_s27, %s1425_s26 }
   0xc   : > { %p311_p1 = scmp.eq.s32.totalorder %s310_s16, 0  ;;  %p324_p2 = scmp.eq.s32.totalorder %s1536_s29, 1 }
   0xd   : > { %p329_p3 = scmp.ne.s32.totalorder %s1425_s26, %s1421_s25  ;;  %p330_p4 = scmp.eq.s32.totalorder %s1093_s30, 1 }
   0xe   : > { %s1551_s17 = scalar_select %p311_p1, %s1429_s27, %s313_s15  }
   0xf   : > { %p1553_p5 = por %p324_p2, %p323_p0  ;;  %p1557_p6 = por %p330_p4, %p329_p3 }
  0x10   : > { %1763 = sst [smem:[#allocation15_spill]] %s1551_s17  ;;  %p1094_p7 = scmp.ge.s32.totalorder %s1433_s28, 1 }
  0x11   : > { %s1764_s18 = scalar_select %p1553_p5, 1, 0 }
  0x12   : > { %s1765_s19 = scalar_select %p1557_p6, 1, 0 }
  0x13   : > { %p337_p8 = scmp.lt.s32.totalorder %s1433_s28, 3  ;;  %p1752_p9 = scmp.eq.s32.totalorder %s1536_s29, 0 }
  0x14   : > { %1766 = sst [smem:[#allocation16_spill]] %s1765_s19  ;;  %s1435_s21 = smov [#allocation2]  }
  0x15   : > { %p1564_p10 = pnand %p1094_p7, %p337_p8  ;;  %s373_s22 = sshll.u32 %s1435_s21, 4  ;;  %s374_s22 = int_to_ptr.vmem [resolvable:$true] %s373_s22 }
  0x16   : > { %s1436_s24 = smov [#allocation5]   ;;  %s1307_s17 = scalar_lea.hbm %s1743_s9, 2048 }
  0x17   : > { %s1767_s20 = scalar_select %p1564_p10, 1, 0 }
  0x18   : > { %p1195_p11 = pneg %p1564_p10  ;;  %s389_s30 = sshll.u32 %s1436_s24, 4  ;;  %s1576_s30 = int_to_ptr.vmem [resolvable:$true] %s389_s30 }
  0x19   : > { %p1308_p13 = scmp.ne.s32.totalorder %s1743_s9, %s1307_s17  ;;  %p1314_p3 = scmp.lt.u32.totalorder %s1307_s17, %s1743_s9 }
  0x1a   : > { %p1572_p12 = pnand %p1752_p9, %p1195_p11 }
  0x1c   : > { %p1309_p0 = pneg %p1572_p12 }
  0x1e   : > { %p1310_p1 = pnand %p1309_p0, %p1308_p13 }
  0x20   : > { %p1311_p2 = pneg %p1310_p1 }
  0x22   : > { %p1316_p4 = pnand %p1314_p3, %p1311_p2 }
  0x24   : > { %1319 = shalt.err (!%p1316_p4)
}
  0x25   : > { %s1320_s24 = scalar_lea.vmem %s374_s22, 2048  ;;  %p1328_p9 = scmp.lt.s32.totalorder %s374_s22, %s374_s22 }
  0x26   : > { %p1321_p7 = scmp.ne.s32.totalorder %s374_s22, %s1320_s24  ;;  %p1329_p6 = scmp.lt.s32.totalorder %s1320_s24, %s1320_s24 }
  0x28   : > { %p1323_p8 = pnand %p1321_p7, %p1309_p0  ;;  %p1330_p5 = por %p1329_p6, %p1328_p9 }
  0x2a   : > { %p1324_p11 = pneg %p1323_p8 }
  0x2c   : > { %p1331_p10 = pnand %p1330_p5, %p1324_p11 }
  0x2e   : > { %1334 = shalt.err (!%p1331_p10)
}
  0x2f   : > { %s1437_s27 = smov 128   ;;  %s1438_s15 = smov 8  }
  0x30   : > { %1198 = dma.hbm_to_vmem [thread:$0]  (!%p1572_p12), %s1743_s9, 2048, %s374_s22, [#allocation3], %s1437_s27, %s1437_s27, %s1438_s15  }
  0x31   : > { %s1335_s21 = scalar_lea.hbm %s1745_s11, 2048 }
  0x32   : > { %p1336_p13 = scmp.ne.s32.totalorder %s1745_s11, %s1335_s21  ;;  %p1342_p9 = scmp.lt.u32.totalorder %s1335_s21, %s1745_s11 }
  0x34   : > { %p1338_p5 = pnand %p1336_p13, %p1309_p0 }
  0x36   : > { %p1339_p6 = pneg %p1338_p5 }
  0x38   : > { %p1344_p10 = pnand %p1342_p9, %p1339_p6 }
  0x3a   : > { %1347 = shalt.err (!%p1344_p10)
}
  0x3b   : > { %s1348_s22 = scalar_lea.vmem %s1576_s30, 2048  ;;  %p1356_p4 = scmp.lt.s32.totalorder %s1576_s30, %s1576_s30 }
  0x3c   : > { %p1349_p1 = scmp.ne.s32.totalorder %s1576_s30, %s1348_s22  ;;  %p1357_p7 = scmp.lt.s32.totalorder %s1348_s22, %s1348_s22 }
  0x3e   : > { %p1351_p2 = pnand %p1349_p1, %p1309_p0  ;;  %p1358_p8 = por %p1357_p7, %p1356_p4 }
  0x40   : > { %p1352_p3 = pneg %p1351_p2 }
  0x42   : > { %p1359_p11 = pnand %p1358_p8, %p1352_p3 }
  0x44   : > { %1362 = shalt.err (!%p1359_p11)
}
  0x45   : > { %s1439_s13 = smov 64   ;;  %s1440_s25 = smov 4  }
  0x46   : > { %1201 = dma.hbm_to_vmem [thread:$0]  (!%p1572_p12), %s1745_s11, 2048, %s1576_s30, [#allocation6], %s1439_s13, %s1439_s13, %s1440_s25  }
  0x47   : > { %p1769_p13 = scmp.ne.s32.totalorder %s1767_s20, 0 }
  0x48   : > { %p1770_p0 = scmp.eq.s32.totalorder (!%p1769_p13), %s1536_s29, 0 }
  0x49   : > { %415 = sbr.rel (%p1769_p13) target bundleno = 1359 (0x54f), region = 72 }
  0x50   : > { %1408 = dma.done.wait (%p1770_p0), [#allocation3], 2048   ;;  %p1771_p5 = pmov %p1770_p0 }
  0x51   : > { %p1772_p6 = pmov %p1770_p0 }
  0x52   : > { %1410 = vsyncadd (%p1771_p5), [#allocation3], 4294965248 }
  0x53   : > { %1412 = dma.done.wait (%p1772_p6), [#allocation6], 2048   ;;  %p1773_p9 = pmov %p1770_p0 }
  0x54   : > { %p462_p10 = scmp.lt.s32.totalorder %s1536_s29, 1  ;;  %v1441_v2 = vmov 0.0   ;;  %vm1442_vm0 = vmmov 0   ;;  %v501_v3 = vld [vmem:[%s1738_s4] sm:$0xff]  ;;  %v1443_v4 = vmov 0   ;;  %v502_v5 = vld [vmem:[%s1738_s4 + $0x8] sm:$0xff] }
  0x55   : > { %1414 = vsyncadd (%p1773_p9), [#allocation6], 4294965248  ;;  %1173 = vmatprep.subr.bf16.mxu0 %v1441_v2  ;;  %1179 = vmatprep.subr.bf16.mxu1 %v1441_v2  ;;  %v1103_v15 = vld [vmem:[%s1735_s1] ss:$0 sm:$0xff]  ;;  %vm522_vm1 = vcmask 1043456   ;;  %vm518_vm2 = vcmask 64512  }
  0x56   : > { %s463_s23 = scalar_select %p462_p10, %s1536_s29, 1  ;;  %1175 = vmatprep.mubr.msk.bf16.mxu0 %vm1442_vm0, %v1441_v2  ;;  %1181 = vmatprep.mubr.msk.bf16.mxu1 %vm1442_vm0, %v1441_v2  ;;  %v1104_v17 = vld [vmem:[%s1736_s2] ss:$0 sm:$0xff]  ;;  %vm585_vm3 = vcmask 130048   ;;  %v1257_v45 = vld [vmem:[#allocation2 + $0x4] ss:$8 sps:$4 sm:$0xff]  }
  0x57   : > { %1252 = vset.pattern.permute.xlu1 %v1443_v4  ;;  %1253 = vset.pattern.permute.xlu0 %v1443_v4  ;;  %v1254_v22 = vld [vmem:[%s1737_s3] sm:$0xff]   ;;  %v1260_v54 = vld [vmem:[#allocation2 + $0x14] ss:$8 sps:$4 sm:$0xff]   ;;  %v1258_v55 = vld [vmem:[#allocation2 + $0x10] ss:$8 sps:$4 sm:$0xff]   ;;  %s459_s22 = sand.u32 1, %s1425_s26  }
  0x58   : > { %s1102_s30 = sshll.u32 %s463_s23, 3  ;;  %505 = vperm.xlu1 %1252, %v501_v3   ;;  %v579_v23 = vld [vmem:[%s1740_s6] sm:$0xff]  ;;  %v1266_v58 = vld [vmem:[#allocation2 + $0x34] ss:$8 sps:$4 sm:$0xff]   ;;  %v1264_v59 = vld [vmem:[#allocation2 + $0x30] ss:$8 sps:$4 sm:$0xff]  }
  0x59   : > { %s465_s14 = scalar_lea.vmem %s1734_s0, %s1102_s30  ;;  %v578_v43 = vld [vmem:[%s1739_s5] sm:$0xf]  ;;  %v1263_v56 = vld [vmem:[#allocation2 + $0x24] ss:$8 sps:$4 sm:$0xff]   ;;  %v1272_v62 = vld [vmem:[#allocation2 + $0x54] ss:$8 sps:$4 sm:$0xff]  }
  0x5a   : > { %v1640_v0 = vld [vmem:[%s465_s14] sm:$0xff]  ;;  %v1270_v63 = vld [vmem:[#allocation2 + $0x50] ss:$8 sps:$4 sm:$0xff]   ;;  %v1278_v2 = vld [vmem:[#allocation2 + $0x74] ss:$8 sps:$4 sm:$0xff]   ;;  %s1101_s13 = sshll.u32 %s459_s22, 3 }
  0x5b   : > { %470 = vadd.xlane.f32.xlu0 %v1640_v0  ;;  %v474_v1 = vmul.f32 %v1640_v0, %v1640_v0  ;;  %v1255_v44 = vld [vmem:[#allocation2] ss:$8 sps:$4 sm:$0xff]   ;;  %v1269_v61 = vld [vmem:[#allocation2 + $0x44] ss:$8 sps:$4 sm:$0xff]   ;;  %v1276_v3 = vld [vmem:[#allocation2 + $0x70] ss:$8 sps:$4 sm:$0xff]  }
  0x5c   : > { %510 = vperm.xlu1 %1252, %v502_v5   ;;  %v1261_v57 = vld [vmem:[#allocation2 + $0x20] ss:$8 sps:$4 sm:$0xff]   ;;  %s1144_s27 = sshll.u32 %s1536_s29, 7  ;;  %s461_s23 = scalar_lea.vmem [#allocation7], %s1101_s13 }
  0x5d   : > { %v1267_v60 = vld [vmem:[#allocation2 + $0x40] ss:$8 sps:$4 sm:$0xff]   ;;  %s1012_s30 = sshll.u32 %s461_s23, 4  ;;  %s1774_s14 = sld [smem:[#allocation17_spill]]  ;;  %s1694_s30 = int_to_ptr.vmem [resolvable:$true] %s1012_s30 }
  0x5e   : > { %v1280_v5 = vld [vmem:[#allocation5] sm:$0xff]   ;;  %s999_s19 = scalar_lea.sflag [#allocation4], %s459_s22  ;;  %s1363_s16 = scalar_lea.vmem %s1694_s30, 128 }
  0x5f   : > { %475 = vadd.xlane.f32.xlu0 %v474_v1  ;;  %v1273_v1 = vld [vmem:[#allocation2 + $0x60] ss:$8 sps:$4 sm:$0xff]   ;;  %p1364_p12 = scmp.ne.s32.totalorder %s1694_s30, %s1363_s16  ;;  %p1775_p1 = scmp.ne.s32.totalorder %s1764_s18, 0 }
  0x60   : > { %s1444_s29 = smov [#allocation7]  }
  0x61   : > { %p1365_p2 = pnand %p1364_p12, %p1775_p1  ;;  %s1367_s21 = sshll.u32 %s1444_s29, 4  ;;  %s1368_s21 = int_to_ptr.vmem [resolvable:$false] %s1367_s21 }
  0x62   : > { %s1369_s24 = scalar_lea.vmem %s1368_s21, 256  ;;  %p1370_p4 = scmp.lt.s32.totalorder %s1694_s30, %s1368_s21 }
  0x63   : > { %s1692_s17 = scalar_lea.hbm %s1774_s14, %s1144_s27  ;;  %p1366_p3 = pneg %p1365_p2 }
  0x64   : > { %p1371_p7 = scmp.lt.s32.totalorder %s1369_s24, %s1363_s16 }
  0x66   : > { %p1372_p8 = por %p1371_p7, %p1370_p4 }
  0x68   : > { %p1373_p11 = pnand %p1372_p8, %p1366_p3 }
  0x75   : > { %582 = vperm.xlu0 %1253, %v579_v23   ;;  %v1283_v23 = vld [vmem:[#allocation5 + $0x50] sm:$0xff]  }
  0xd7   : > { %v506_v24 = vpop.permute.xlu1 %505 }
  0xdb   : > { %v511_v28 = vpop.permute.xlu1 %510 }
  0xe8   : > { %v471_v6 = vpop.xlane.xlu0 %470 }
  0xe9   : > { %v473_v7 = vmul.f32 0.0078125, %v471_v6  ;;  %v1281_v6 = vld [vmem:[#allocation5 + $0x48] sm:$0xff]  }
  0xeb   : > { %v478_v9 = vmul.f32 %v473_v7, %v473_v7  ;;  %v480_v13 = vsub.f32 %v1640_v0, %v473_v7  ;;  %v1282_v7 = vld [vmem:[#allocation5 + $0x8] sm:$0xff]  }
  0xec   : > { %v476_v8 = vpop.xlane.xlu0 %475 }
  0xed   : > { %v477_v10 = vmul.f32 0.0078125, %v476_v8 }
  0xef   : > { %v479_v11 = vsub.f32 %v477_v10, %v478_v9 }
  0xf1   : > { %v481_v12 = vadd.f32 1e-05, %v479_v11 }
  0xf3   : > { %1295 = vrsqrt.f32 %v481_v12 }
  0xf4   : > { %v583_v46 = vpop.permute.xlu0 %582 }
  0xfd   : > { %v1296_v14 = vpop.eup %1295 }
  0xfe   : > { %v483_v16 = vmul.f32 %v1296_v14, %v480_v13 }
 0x100   : > { %v490_v18 = vmul.f32 %v1103_v15, %v483_v16 }
 0x102   : > { %v497_v19 = vadd.f32 %v1104_v17, %v490_v18  ;;  %v1108_v17 = vld [vmem:[%s1741_s7] ss:$0 sm:$0xff] }
 0x104   : > { %v498_v20 = vpack.c.bf16 %v497_v19, %v497_v19  ;;  %v1109_v19 = vld [vmem:[%s1742_s8] ss:$0 sm:$0xff] }
 0x106   : > { %v524_v21 = vsel %vm522_vm1, %v498_v20, 0 }
 0x107   : > { %1174 = vmatpush3.bf16.msra.mxu0 %v524_v21 }
 0x108   : > { %768 = vmatprep.subr.bf16.mxu0 %v1257_v45 }
 0x10a   : > { %1176 = vmatmul.mubr.msk.bf16.vlgmr.msra.gmra.mrb[0].mxu0 %vm518_vm2, %v1254_v22 }
 0x10b   : > { %800 = vmatprep.mubr.bf16.mxu0 %v1443_v4  ;;  %769 = vmatpush1.bf16.msra.mxu0 %v1255_v44  ;;  %v1279_v4 = vld [vmem:[#allocation5 + $0x40] sm:$0xff]  }
 0x10c   : > { %770 = vmatprep.subr.bf16.mxu0 %v1260_v54 }
 0x10f   : > { %771 = vmatpush1.bf16.msra.mxu0 %v1258_v55 }
 0x110   : > { %772 = vmatprep.subr.bf16.mxu0 %v1263_v56 }
 0x113   : > { %773 = vmatpush1.bf16.msra.mxu0 %v1261_v57 }
 0x114   : > { %774 = vmatprep.subr.bf16.mxu0 %v1266_v58 }
 0x117   : > { %775 = vmatpush1.bf16.msra.mxu0 %v1264_v59 }
 0x118   : > { %776 = vmatprep.subr.bf16.mxu0 %v1269_v61 }
 0x11b   : > { %777 = vmatpush1.bf16.msra.mxu0 %v1267_v60 }
 0x11c   : > { %778 = vmatprep.subr.bf16.mxu0 %v1272_v62  ;;  %v1126_v62 = vld [vmem:[%s1746_s12] ss:$0 sm:$0xff] }
 0x11f   : > { %779 = vmatpush1.bf16.msra.mxu0 %v1270_v63 }
 0x1dd   : > { %v560_v25 = vpop.f32.mrb[0].mxu0 }
 0x1de   : > { %v561_v26 = vadd.f32 %v560_v25, %v506_v24  ;;  %v1177_v27 = vpop.f32.mrb[1].mxu0  ;;  %v1284_v24 = vld [vmem:[#allocation5 + $0x10] sm:$0xff]   ;;  %v1285_v25 = vld [vmem:[#allocation5 + $0x58] sm:$0xff]  }
 0x1df   : > { %v563_v29 = vpop.f32.mrb[2].mxu0  ;;  %v1287_v27 = vld [vmem:[#allocation5 + $0x60] sm:$0xff]  }
 0x1e0   : > { %v569_v30 = vmul.f32 0.70710677, %v561_v26  ;;  %v564_v31 = vadd.f32 %v563_v29, %v511_v28  ;;  %v1178_v32 = vpop.f32.mrb[3].mxu0  ;;  %v567_v37 = vmul.f32 0.5, %v561_v26  ;;  %v1286_v26 = vld [vmem:[#allocation5 + $0x18] sm:$0xff]   ;;  %v1288_v28 = vld [vmem:[#allocation5 + $0x20] sm:$0xff]  }
 0x1e1   : > { %v1289_v29 = vld [vmem:[#allocation5 + $0x68] sm:$0xff]   ;;  %v1292_v32 = vld [vmem:[#allocation5 + $0x30] sm:$0xff]  }
 0x1e2   : > { %1297 = verf.f32 %v569_v30  ;;  %v570_v33 = vmul.f32 0.70710677, %v564_v31  ;;  %v568_v38 = vmul.f32 0.5, %v564_v31  ;;  %v1290_v30 = vld [vmem:[#allocation5 + $0x28] sm:$0xff]   ;;  %v1291_v31 = vld [vmem:[#allocation5 + $0x70] sm:$0xff]  }
 0x1e4   : > { %1299 = verf.f32 %v570_v33  ;;  %v1293_v33 = vld [vmem:[#allocation5 + $0x78] sm:$0xff]  }
 0x1ec   : > { %v1298_v34 = vpop.eup %1297 }
 0x1ed   : > { %v573_v35 = vadd.f32 1.0, %v1298_v34  ;;  %v1294_v34 = vld [vmem:[#allocation5 + $0x38] sm:$0xff]  }
 0x1ee   : > { %v1300_v36 = vpop.eup %1299 }
 0x1ef   : > { %v574_v39 = vadd.f32 1.0, %v1300_v36  ;;  %v575_v40 = vmul.f32 %v573_v35, %v567_v37  ;;  %v678_v35 = vlaneseq }
 0x1f1   : > { %v576_v41 = vmul.f32 %v574_v39, %v568_v38  ;;  %v679_v36 = vshrl.u32 %v678_v35, 7  ;;  %v676_v38 = vld [vmem:[%s1744_s10] sm:$0x3] }
 0x1f3   : > { %v577_v42 = vpack.c.bf16 %v576_v41, %v575_v40  ;;  %v680_v37 = vsub.s32 0, %v679_v36  ;;  %v684_v39 = vsub.s32 1, %v679_v36 }
 0x1f5   : > { %1180 = vmatpush3.bf16.msra.mxu1 %v577_v42  ;;  %v681_v40 = vrot.slane %v676_v38, %v680_v37  ;;  %v685_v41 = vrot.slane %v676_v38, %v684_v39 }
 0x1f6   : > { %1151 = vmatprep.subr.bf16.mxu1 %v1279_v4 }
 0x1f8   : > { %1182 = vmatmul.mubr.msk.bf16.vlgmr.msra.gmra.mrb[0].mxu1 %vm585_vm3, %v578_v43 }
 0x1f9   : > { %1152 = vmatpush3.bf16.msra.mxu1 %v1280_v5 }
 0x1fa   : > { %1153 = vmatprep.subr.bf16.mxu1 %v1281_v6 }
 0x1fd   : > { %1154 = vmatpush3.bf16.msra.mxu1 %v1282_v7 }
 0x1fe   : > { %1155 = vmatprep.subr.bf16.mxu1 %v1283_v23 }
 0x201   : > { %1156 = vmatpush3.bf16.msra.mxu1 %v1284_v24 }
 0x202   : > { %1157 = vmatprep.subr.bf16.mxu1 %v1285_v25 }
 0x205   : > { %1158 = vmatpush3.bf16.msra.mxu1 %v1286_v26 }
 0x206   : > { %1159 = vmatprep.subr.bf16.mxu1 %v1287_v27 }
 0x209   : > { %1160 = vmatpush3.bf16.msra.mxu1 %v1288_v28 }
 0x20a   : > { %1161 = vmatprep.subr.bf16.mxu1 %v1289_v29 }
 0x20d   : > { %1162 = vmatpush3.bf16.msra.mxu1 %v1290_v30 }
 0x20e   : > { %1163 = vmatprep.subr.bf16.mxu1 %v1291_v31 }
 0x211   : > { %1164 = vmatpush3.bf16.msra.mxu1 %v1292_v32 }
 0x212   : > { %1165 = vmatprep.subr.bf16.mxu1 %v1293_v33 }
 0x215   : > { %1166 = vmatpush3.bf16.msra.mxu1 %v1294_v34 }
 0x2cb   : > { %v623_v47 = vpop.f32.mrb[0].mxu1 }
 0x2cc   : > { %v624_v48 = vadd.f32 %v623_v47, %v583_v46  ;;  %v1183_v49 = vpop.f32.mrb[1].mxu1 }
 0x2cd   : > { %v626_v50 = vpop.f32.mrb[2].mxu1 }
 0x2ce   : > { %v1668_v51 = vadd.f32 %v624_v48, %v1640_v0  ;;  %v1184_v52 = vpop.f32.mrb[3].mxu1  ;;  %v1275_v0 = vld [vmem:[#allocation2 + $0x64] ss:$8 sps:$4 sm:$0xff]  }
 0x2cf   : > { %780 = vmatprep.subr.bf16.mxu0 %v1275_v0 }
 0x2d0   : > { %632 = vadd.xlane.f32.xlu1 %v1668_v51  ;;  %v635_v53 = vmul.f32 %v1668_v51, %v1668_v51  ;;  %781 = vmatpush1.bf16.msra.mxu0 %v1273_v1 }
 0x2d1   : > { %782 = vmatprep.subr.bf16.mxu0 %v1278_v2 }
 0x2d4   : > { %636 = vadd.xlane.f32.xlu1 %v635_v53  ;;  %783 = vmatpush1.bf16.msra.mxu0 %v1276_v3 }
 0x35d   : > { %v633_v8 = vpop.xlane.xlu1 %632 }
 0x35e   : > { %v634_v9 = vmul.f32 0.0078125, %v633_v8 }
 0x360   : > { %v639_v11 = vmul.f32 %v634_v9, %v634_v9  ;;  %v641_v15 = vsub.f32 %v1668_v51, %v634_v9 }
 0x361   : > { %v637_v10 = vpop.xlane.xlu1 %636 }
 0x362   : > { %v638_v12 = vmul.f32 0.0078125, %v637_v10 }
 0x364   : > { %v640_v13 = vsub.f32 %v638_v12, %v639_v11 }
 0x366   : > { %v642_v14 = vadd.f32 1e-05, %v640_v13 }
 0x368   : > { %1301 = vrsqrt.f32 %v642_v14 }
 0x372   : > { %v1302_v16 = vpop.eup %1301 }
 0x373   : > { %v644_v18 = vmul.f32 %v1302_v16, %v641_v15 }
 0x375   : > { %v651_v20 = vmul.f32 %v1108_v17, %v644_v18 }
 0x377   : > { %v658_v21 = vadd.f32 %v1109_v19, %v651_v20 }
 0x379   : > { %v659_v22 = vpack.c.bf16 %v658_v21, %v658_v21 }
 0x37b   : > { %801 = vmatmul.mubr.bf16.vlgmr.msra.gmra.mrb[4].mxu0 %v659_v22 }
 0x44e   : > { %v802_v42 = vpop.f32.mrb[4].mxu0 }
 0x44f   : > { %v803_v43 = vadd.f32 %v802_v42, %v681_v40  ;;  %v804_v44 = vpop.f32.mrb[5].mxu0 }
 0x450   : > { %v805_v45 = vadd.f32 %v804_v44, %v685_v41  ;;  %v806_v46 = vpop.f32.mrb[6].mxu0 }
 0x451   : > { %v811_v47 = vmul.f32 0.70710677, %v803_v43  ;;  %v807_v48 = vpop.f32.mrb[7].mxu0  ;;  %v809_v53 = vmul.f32 0.5, %v803_v43 }
 0x452   : > { %v812_v49 = vmul.f32 0.70710677, %v805_v45  ;;  %v810_v55 = vmul.f32 0.5, %v805_v45 }
 0x453   : > { %1303 = verf.f32 %v811_v47 }
 0x454   : > { %1305 = verf.f32 %v812_v49 }
 0x45d   : > { %v1304_v50 = vpop.eup %1303 }
 0x45e   : > { %v1306_v52 = vpop.eup %1305  ;;  %v815_v54 = vadd.f32 1.0, %v1304_v50 }
 0x45f   : > { %v816_v56 = vadd.f32 1.0, %v1306_v52 }
 0x460   : > { %v817_v57 = vmul.f32 %v815_v54, %v809_v53 }
 0x461   : > { %v818_v58 = vmul.f32 %v816_v56, %v810_v55 }
 0x462   : > { %v819_v60 = vpack.c.bf16 %v817_v57, %v817_v57 }
 0x463   : > { %v820_v59 = vpack.c.bf16 %v818_v58, %v818_v58 }
 0x465   : > { %988 = vmatprep.mubr.bf16.mxu1 %v820_v59 }
 0x466   : > { %989 = vmatmul.mubr.bf16.vlgmr.msra.gmra.mrb[4].mxu1 %v819_v60 }
 0x539   : > { %v1167_v61 = vpop.f32.mrb[4].mxu1 }
 0x53a   : > { %v1168_v63 = vpop.f32.mrb[5].mxu1 }
 0x53b   : > { %v1169_v0 = vadd.f32 %v1168_v63, %v1167_v61  ;;  %v1170_v1 = vpop.f32.mrb[6].mxu1 }
 0x53c   : > { %v1171_v2 = vpop.f32.mrb[7].mxu1 }
 0x53d   : > { %v991_v3 = vadd.f32 %v1169_v0, %v1126_v62 }
 0x53f   : > { %v996_v4 = vadd.f32 %v991_v3, %v1668_v51 }
 0x541   : > { %997 = vst [vmem:[%s461_s23] sm:$0xff] %v996_v4 }
 0x542   : > { %1376 = shalt.err (!%p1373_p11)
}
 0x543   : > { %s1377_s22 = scalar_lea.hbm %s1692_s17, 128  ;;  %s1381_s28 = scalar_lea.hbm %s1774_s14, 256 }
 0x544   : > { %p1378_p13 = scmp.ne.s32.totalorder %s1692_s17, %s1377_s22  ;;  %p1382_p6 = scmp.lt.u32.totalorder %s1692_s17, %s1774_s14 }
 0x545   : > { %p1383_p9 = scmp.lt.u32.totalorder %s1381_s28, %s1377_s22  ;;  %p1385_p12 = scmp.lt.u32.totalorder %s1377_s22, %s1692_s17 }
 0x546   : > { %p1379_p0 = pnand %p1378_p13, %p1775_p1 }
 0x547   : > { %p1384_p10 = por %p1383_p9, %p1382_p6 }
 0x548   : > { %p1380_p5 = pneg %p1379_p0 }
 0x549   : > { %p1386_p2 = por %p1385_p12, %p1384_p10 }
 0x54b   : > { %p1387_p3 = pnand %p1386_p2, %p1380_p5 }
 0x54d   : > { %1390 = shalt.err (!%p1387_p3)
}
 0x54e   : > { %1193 = dma.vmem_to_hbm [thread:$0]  (%p1775_p1), %s1694_s30, 128, %s1692_s17, %s999_s19  }
 0x54f PF: > { %s1776_s15 = sld [smem:[#allocation13_spill]]  ;;  %s1777_s20 = sld [smem:[#allocation11_spill]] }
 0x550   : > { %s1778_s16 = sld [smem:[#allocation16_spill]] }
 0x555   : > { %p1210_p4 = scmp.ge.s32.totalorder %s1776_s15, 2  ;;  %s1024_s29 = sand.u32 1, %s1777_s20  }
 0x556   : > { %p1779_p7 = scmp.ne.s32.totalorder %s1778_s16, 0  ;;  %s1025_s21 = scalar_lea.sflag [#allocation4], %s1024_s29 }
 0x558   : > { %p1203_p8 = pnand %p1210_p4, %p1779_p7 }
 0x55a   : > { %1416 = dma.done.wait (!%p1203_p8), %s1025_s21, 128  }
 0x55b   : > { %1418 = vsyncadd (!%p1203_p8), %s1025_s21, 4294967168  ;;  %s1780_s28 = sld [smem:[#allocation14_spill]]  ;;  %s1781_s24 = sld [smem:[#allocation12_spill]] }
 0x55c   : > { %s1782_s27 = sld [smem:[#allocation15_spill]]  ;;  %s1783_s25 = smov %s1425_s26 }
 0x561   : > { %p25_p11 = scmp.ge.s32.totalorder %s1780_s28, 4   ;;  %s1784_s26 = smov %s1781_s24 }
 0x563   :  { %27 = sbr.rel (!%p25_p11) target bundleno = 7 (0x7), region = 116 }
 0x56a   :  { %1030 = vsyncpa [#allocation3], 1 }
 0x56b   :  { %1032 = vsyncpa [#allocation3 + $0x1], 1 }
 0x56c   :  { %1033 = vsyncpa [#allocation6], 1 }
 0x56d   :  { %1034 = vsyncpa [#allocation4], 1 }
 0x56e   :  { %1036 = vsyncpa [#allocation4 + $0x1], 1 }

</bundles_post_ra>
